<compile_context>
chip_gen: v5e
topology: v5e:2x2
jax: 0.10.0
libtpu: 0.0.40
codegen_flags: <defaults>
</compile_context>

<pallas_src>
import functools

import jax
import jax.numpy as jnp
from jax.experimental import pallas as pl
from jax.experimental.pallas import tpu as pltpu


def _score_kernel(user_ref, items_ref, out_ref):
    # user_ref : (1, D)   user embedding row, resident across the grid
    # items_ref: (TN, D)  contiguous row-major item tile straight from HBM
    # out_ref  : (1, TN)  lane-dense output block (TN % 128 == 0)
    u = user_ref[...].astype(jnp.float32)       # (1, D)
    x = items_ref[...].astype(jnp.float32)      # (TN, D)
    # Single MXU contraction over D: (1, D) . (TN, D)^T -> (1, TN), f32 acc.
    out_ref[...] = jax.lax.dot_general(
        u, x,
        dimension_numbers=(((1,), (1,)), ((), ())),
        preferred_element_type=jnp.float32,
    )


def _round_up(x, m):
    return ((x + m - 1) // m) * m


@functools.partial(jax.jit, static_argnames=("tn",))
def fedrec_forward(user_emb, items_emb, *, tn=32768):
    """scores[n] = sum_d user_emb[0, d] * items_emb[n, d]  (FedRec forward)."""
    N, D = items_emb.shape
    assert user_emb.shape == (1, D)

    # Item tile: 128-aligned on the item axis; capped at ceil(N/2) so the
    # parallel grid axis has >= 2 steps (keeps both v7x TCs busy), and at `tn`
    # (default 32768 items = 4 MiB f32/tile, 8 MiB double-buffered -> fits the
    # default scoped VMEM on v5e/v6e/v7x without a vmem_limit override).
    tn_eff = min(_round_up(tn, 128), max(128, _round_up(pl.cdiv(N, 2), 128)))
    n_blocks = pl.cdiv(N, tn_eff)
    n_alloc = n_blocks * tn_eff          # padded output; tail waste <= one tile

    out = pl.pallas_call(
        _score_kernel,
        out_shape=jax.ShapeDtypeStruct((1, n_alloc), jnp.float32),
        grid_spec=pl.GridSpec(
            grid=(n_blocks,),
            in_specs=[
                pl.BlockSpec((1, D), lambda i: (0, 0)),        # user row (resident)
                pl.BlockSpec((tn_eff, D), lambda i: (i, 0)),   # contiguous item tile
            ],
            out_specs=pl.BlockSpec((1, tn_eff), lambda i: (0, i)),
        ),
        compiler_params=pltpu.CompilerParams(
            dimension_semantics=("parallel",),
        ),
    )(user_emb, items_emb)

    return out[0, :N]                                           # (N,) f32


if __name__ == "__main__":
    # Deterministic synthetic parameters / inputs (no checkpoint loading).
    dim = 32
    key = jax.random.PRNGKey(0)
    k_user, k_items_a, k_items_b = jax.random.split(key, 3)

    # nn.Embedding(1, dim) with nn.init.normal_(std=0.01)
    user_emb = (0.01 * jax.random.normal(k_user, (1, dim))).astype(jnp.float32)

    # Case 1: ragged N (not a multiple of 128) -> exercises the padded final
    # input block and the >=2-step tile clamp (tn_eff=256, 2 grid steps).
    items_a = jax.random.normal(k_items_a, (300, dim), dtype=jnp.float32)
    scores_a = jax.block_until_ready(fedrec_forward(user_emb, items_a))
    ref_a = jnp.sum(user_emb * items_a, axis=-1)
    assert scores_a.shape == (300,)
    assert scores_a.dtype == jnp.float32
    assert jnp.allclose(scores_a, ref_a, atol=1e-5, rtol=1e-5)

    # Case 2: larger N with a small explicit tile -> 4-step grid.
    items_b = jax.random.normal(k_items_b, (1024, dim), dtype=jnp.float32)
    scores_b = jax.block_until_ready(fedrec_forward(user_emb, items_b, tn=256))
    ref_b = jnp.sum(user_emb * items_b, axis=-1)
    assert scores_b.shape == (1024,)
    assert jnp.allclose(scores_b, ref_b, atol=1e-5, rtol=1e-5)

    print("KERNEL_OK")
</pallas_src>

<mosaic_0001>
module attributes {stable_mosaic.version = 11 : i64} {
  func.func @_score_kernel(%arg0: i32, %arg1: memref<1x32xf32, #tpu.memory_space<vmem>>, %arg2: memref<256x32xf32, #tpu.memory_space<vmem>>, %arg3: memref<1x256xf32, #tpu.memory_space<vmem>>) attributes {dimension_semantics = [#tpu.dimension_semantics<parallel>], iteration_bounds = array<i64: 2>, scalar_prefetch = 0 : i64, scratch_operands = 0 : i64, tpu.core_type = #tpu.core_type<tc>, window_params = [{pipeline_mode = #tpu.pipeline_mode<synchronous>, transform_indices = @transform_0, window_bounds = array<i64: 1, 32>}, {transform_indices = @transform_1, window_bounds = array<i64: 256, 32>}, {transform_indices = @transform_2, window_bounds = array<i64: 1, 256>}]} {
    %c0 = arith.constant 0 : index
    %c0_0 = arith.constant 0 : index
    %0 = vector.load %arg1[%c0, %c0_0] : memref<1x32xf32, #tpu.memory_space<vmem>>, vector<1x32xf32>
    %c0_1 = arith.constant 0 : index
    %c0_2 = arith.constant 0 : index
    %1 = vector.load %arg2[%c0_1, %c0_2] : memref<256x32xf32, #tpu.memory_space<vmem>>, vector<256x32xf32>
    %cst = arith.constant dense<0.000000e+00> : vector<1x256xf32>
    %2 = tpu.matmul %0, %1, %cst {dimension_numbers = #tpu.dot_dimension_numbers<[1], [1], [0], [0], [0, 0, 1, 0], [], []>} : vector<1x32xf32>, vector<256x32xf32>, vector<1x256xf32> -> vector<1x256xf32>
    %c0_3 = arith.constant 0 : index
    %c0_4 = arith.constant 0 : index
    %3 = vector.load %arg3[%c0_3, %c0_4] : memref<1x256xf32, #tpu.memory_space<vmem>>, vector<1x256xf32>
    tpu.vector_store %arg3[%c0_3, %c0_4], %2 {strides = array<i32>} : memref<1x256xf32, #tpu.memory_space<vmem>>, vector<1x256xf32>,
    return
  }
  func.func @transform_0(%arg0: i32) -> (i32, i32) {
    %c0_i32 = arith.constant 0 : i32
    %c0_i32_0 = arith.constant 0 : i32
    %c0_i32_1 = arith.constant 0 : i32
    return %c0_i32, %c0_i32_0 : i32, i32
  }
  func.func @transform_1(%arg0: i32) -> (i32, i32) {
    %c0_i32 = arith.constant 0 : i32
    %c0_i32_0 = arith.constant 0 : i32
    return %arg0, %c0_i32 : i32, i32
  }
  func.func @transform_2(%arg0: i32) -> (i32, i32) {
    %c0_i32 = arith.constant 0 : i32
    %c0_i32_0 = arith.constant 0 : i32
    return %c0_i32, %arg0 : i32, i32
  }
}

</mosaic_0001>

<bundles_post_ra>
// kernel: fedrec_forward.1
= control target key start
LH: loop header
LB: loop body
LE: loop exit
PB: predicated region body
PF: predicated region fallthrough
CT: control target
= control target key end

     0   :  { %s474_s9 = smov 0   ;;  %s566_s0 = inlined_call_operand.vmem [shape: f32[1,32], index: 0, kind: input, shape index: {}]   ;;  %s567_s1 = inlined_call_operand.vmem [shape: f32[300,32], index: 1, kind: input, shape index: {}]   ;;  %s568_s2 = inlined_call_operand.vmem [shape: f32[1,512], index: 2, kind: output, shape index: {}]  }
   0x1 LB: > { %s399_s10 = sadd.s32 4294967295, %s457_s9   ;;  %p403_p0 = scmp.ge.s32.totalorder %s457_s9, 1  ;;  %s457_s9 = sphi %s474_s9, %s12_s9  }
   0x2   : > { %p121_p1 = scmp.lt.s32.totalorder %s457_s9, 3 }
   0x4   : > { %p122_p2 = pnand %p403_p0, %p121_p1 }
   0x5   : > { %s404_s11 = sshll.u32 (!%p122_p2), %s399_s10, 5  ;;  %s406_s18 = sshll.u32 (!%p122_p2), %s399_s10, 1 }
   0x6   : > { %125 = sbr.rel (%p122_p2) target bundleno = 208 (0xd0), region = 28  ;;  %p151_p3 = scmp.lt.s32.totalorder (!%p122_p2), %s404_s11, 37 }
   0x7   : > { %p161_p4 = scmp.lt.s32.totalorder (!%p122_p2), %s406_s18, 3 }
   0xb   : > { %s570_s11 = smov (!%p151_p3, %s404_s11), 37  ;;  %vm198_vm0 = vcmask 261120   ;;  %v165_v32 = vld [vmem:[%s566_s0] sm:$0x1]  ;;  %s572_s18 = smov (!%p161_p4, %s406_s18), 3  ;;  %v344_v33 = vlaneseq  ;;  %vm341_vm1 = vcmask 1040384  }
   0xc   : > { %s405_s12 = sshll.u32 %s570_s11, 3  ;;  %s163_s21 = scalar_lea.vmem %s568_s2, %s572_s18 }
   0xd   : > { %s487_s15 = scalar_lea.vmem %s567_s1, %s405_s12  ;;  %vm346_vm2 = vcmp.lt.s32.totalorder %v344_v33, 256 }
   0xe   : > { %v197_v0 = vld [vmem:[%s487_s15 + $0xf8] sm:$0xff]  ;;  %v196_v2 = vld [vmem:[%s487_s15 + $0xf0] sm:$0xff]  ;;  %v195_v4 = vld [vmem:[%s487_s15 + $0xe8] sm:$0xff] }
   0xf   : > { %v181_v1 = vld [vmem:[%s487_s15 + $0x78] sm:$0xff]  ;;  %424 = vmatpush.xpose.msk.msra.mxu1 %vm198_vm0, %v197_v0  ;;  %v180_v3 = vld [vmem:[%s487_s15 + $0x70] sm:$0xff]  ;;  %v179_v5 = vld [vmem:[%s487_s15 + $0x68] sm:$0xff] }
  0x10   : > { %407 = vmatpush.xpose.msk.msra.mxu0 %vm198_vm0, %v181_v1  ;;  %v194_v6 = vld [vmem:[%s487_s15 + $0xe0] sm:$0xff]  ;;  %v193_v8 = vld [vmem:[%s487_s15 + $0xd8] sm:$0xff]  ;;  %v192_v10 = vld [vmem:[%s487_s15 + $0xd0] sm:$0xff] }
  0x11   : > { %v178_v7 = vld [vmem:[%s487_s15 + $0x60] sm:$0xff]  ;;  %v177_v9 = vld [vmem:[%s487_s15 + $0x58] sm:$0xff]  ;;  %v176_v11 = vld [vmem:[%s487_s15 + $0x50] sm:$0xff] }
  0x12   : > { %v191_v12 = vld [vmem:[%s487_s15 + $0xc8] sm:$0xff]  ;;  %v190_v14 = vld [vmem:[%s487_s15 + $0xc0] sm:$0xff]  ;;  %v189_v16 = vld [vmem:[%s487_s15 + $0xb8] sm:$0xff] }
  0x13   : > { %425 = vmatpush.xpose.msk.msra.mxu1 %vm198_vm0, %v196_v2  ;;  %v175_v13 = vld [vmem:[%s487_s15 + $0x48] sm:$0xff]  ;;  %v174_v15 = vld [vmem:[%s487_s15 + $0x40] sm:$0xff]  ;;  %v173_v17 = vld [vmem:[%s487_s15 + $0x38] sm:$0xff] }
  0x14   : > { %408 = vmatpush.xpose.msk.msra.mxu0 %vm198_vm0, %v180_v3  ;;  %v188_v18 = vld [vmem:[%s487_s15 + $0xb0] sm:$0xff]  ;;  %v187_v20 = vld [vmem:[%s487_s15 + $0xa8] sm:$0xff]  ;;  %v186_v22 = vld [vmem:[%s487_s15 + $0xa0] sm:$0xff] }
  0x15   : > { %v172_v19 = vld [vmem:[%s487_s15 + $0x30] sm:$0xff]  ;;  %v171_v21 = vld [vmem:[%s487_s15 + $0x28] sm:$0xff]  ;;  %v170_v23 = vld [vmem:[%s487_s15 + $0x20] sm:$0xff] }
  0x16   : > { %v185_v24 = vld [vmem:[%s487_s15 + $0x98] sm:$0xff]  ;;  %v184_v26 = vld [vmem:[%s487_s15 + $0x90] sm:$0xff]  ;;  %v183_v28 = vld [vmem:[%s487_s15 + $0x88] sm:$0xff] }
  0x17   : > { %426 = vmatpush.xpose.msk.msra.mxu1 %vm198_vm0, %v195_v4  ;;  %v169_v25 = vld [vmem:[%s487_s15 + $0x18] sm:$0xff]  ;;  %v168_v27 = vld [vmem:[%s487_s15 + $0x10] sm:$0xff]  ;;  %v167_v29 = vld [vmem:[%s487_s15 + $0x8] sm:$0xff] }
  0x18   : > { %409 = vmatpush.xpose.msk.msra.mxu0 %vm198_vm0, %v179_v5  ;;  %v182_v30 = vld [vmem:[%s487_s15 + $0x80] sm:$0xff] }
  0x19   : > { %v166_v31 = vld [vmem:[%s487_s15] sm:$0xff] }
  0x1b   : > { %427 = vmatpush.xpose.msk.msra.mxu1 %vm198_vm0, %v194_v6 }
  0x1c   : > { %410 = vmatpush.xpose.msk.msra.mxu0 %vm198_vm0, %v178_v7 }
  0x1f   : > { %428 = vmatpush.xpose.msk.msra.mxu1 %vm198_vm0, %v193_v8 }
  0x20   : > { %411 = vmatpush.xpose.msk.msra.mxu0 %vm198_vm0, %v177_v9 }
  0x23   : > { %429 = vmatpush.xpose.msk.msra.mxu1 %vm198_vm0, %v192_v10 }
  0x24   : > { %412 = vmatpush.xpose.msk.msra.mxu0 %vm198_vm0, %v176_v11 }
  0x27   : > { %430 = vmatpush.xpose.msk.msra.mxu1 %vm198_vm0, %v191_v12 }
  0x28   : > { %413 = vmatpush.xpose.msk.msra.mxu0 %vm198_vm0, %v175_v13 }
  0x2b   : > { %431 = vmatpush.xpose.msk.msra.mxu1 %vm198_vm0, %v190_v14 }
  0x2c   : > { %414 = vmatpush.xpose.msk.msra.mxu0 %vm198_vm0, %v174_v15 }
  0x2f   : > { %432 = vmatpush.xpose.msk.msra.mxu1 %vm198_vm0, %v189_v16 }
  0x30   : > { %415 = vmatpush.xpose.msk.msra.mxu0 %vm198_vm0, %v173_v17 }
  0x33   : > { %433 = vmatpush.xpose.msk.msra.mxu1 %vm198_vm0, %v188_v18 }
  0x34   : > { %416 = vmatpush.xpose.msk.msra.mxu0 %vm198_vm0, %v172_v19 }
  0x37   : > { %434 = vmatpush.xpose.msk.msra.mxu1 %vm198_vm0, %v187_v20 }
  0x38   : > { %417 = vmatpush.xpose.msk.msra.mxu0 %vm198_vm0, %v171_v21 }
  0x3b   : > { %435 = vmatpush.xpose.msk.msra.mxu1 %vm198_vm0, %v186_v22 }
  0x3c   : > { %418 = vmatpush.xpose.msk.msra.mxu0 %vm198_vm0, %v170_v23 }
  0x3f   : > { %436 = vmatpush.xpose.msk.msra.mxu1 %vm198_vm0, %v185_v24 }
  0x40   : > { %419 = vmatpush.xpose.msk.msra.mxu0 %vm198_vm0, %v169_v25 }
  0x43   : > { %437 = vmatpush.xpose.msk.msra.mxu1 %vm198_vm0, %v184_v26 }
  0x44   : > { %420 = vmatpush.xpose.msk.msra.mxu0 %vm198_vm0, %v168_v27 }
  0x47   : > { %438 = vmatpush.xpose.msk.msra.mxu1 %vm198_vm0, %v183_v28 }
  0x48   : > { %421 = vmatpush.xpose.msk.msra.mxu0 %vm198_vm0, %v167_v29 }
  0x4b   : > { %439 = vmatpush.xpose.msk.msra.mxu1 %vm198_vm0, %v182_v30 }
  0x4c   : > { %422 = vmatpush.xpose.msk.msra.mxu0 %vm198_vm0, %v166_v31 }
  0x4e   : > { %440 = vmatmul.msk.f32.vlgmr.msra.gmra.mxu1 %vm198_vm0, %v165_v32 }
  0x4f   : > { %423 = vmatmul.msk.f32.vlgmr.msra.gmra.mxu0 %vm198_vm0, %v165_v32 }
  0xcb   : > { %v335_v34 = vpop.f32.mrf.mxu1 }
  0xcc   : > { %v315_v35 = vpop.f32.mrf.mxu0  ;;  %v340_v36 = vrot.slane %v335_v34, 7 }
  0xce   : > { %v342_v37 = vsel %vm341_vm1, %v315_v35, %v340_v36 }
  0xcf   : > { %348 = vst.msk [vmem:[%s163_s21] sm:$0x3] %vm346_vm2, %v342_v37 }
  0xd0 PF: > { %s12_s9 = sadd.s32 1, %s457_s9  }
  0xd1   : > { %p9_p5 = scmp.ge.s32.totalorder %s12_s9, 4  }
  0xd3   :  { %11 = sbr.rel (!%p9_p5) target bundleno = 1 (0x1), region = 58 }

</bundles_post_ra>
